<compile_context>
chip_gen: v7x
topology: tpu7x:2x2x1
jax: 0.10.0
libtpu: 0.0.40
codegen_flags: <defaults>
</compile_context>

<pallas_src>
import math

import jax
import jax.numpy as jnp
from jax.experimental import pallas as pl
from jax.experimental.pallas import tpu as pltpu


def _sigmoid_exact(x):
    # sigmoid(x) = 0.5 * (1 + tanh(0.5 * x)) -- exact, single EUP tanh push,
    # the scale/shift ops go to otherwise-idle VALU slots.
    return 0.5 * (jnp.tanh(0.5 * x) + 1.0)


def lstm_seq_kernel(x_ref, h0_ref, c0_ref, wih_ref, whh_ref, bg_ref,
                    wm_ref, bm_ref, y_ref, hT_ref, cT_ref, h_scr, c_scr):
    """One grid step == one LSTM timestep.

    Weight refs use constant index_maps -> resident in VMEM for all T steps.
    Recurrent state (h, c) lives in VMEM scratch across grid steps.
    """
    H = h0_ref.shape[-1]
    t = pl.program_id(0)
    last = pl.num_programs(0) - 1

    # Initialize recurrent state from (h0, c0) on the first step.
    @pl.when(t == 0)
    def _():
        h_scr[...] = h0_ref[...]
        c_scr[...] = c0_ref[...]

    h = h_scr[...]                       # (B, H)
    c = c_scr[...]                       # (B, H)
    x = x_ref[0]                         # (B, I)  -- current timestep

    # Gate pre-activations, gate order [i, f, g, o] along the 4H axis.
    gates = (jnp.dot(x, wih_ref[...], preferred_element_type=jnp.float32)
             + jnp.dot(h, whh_ref[...], preferred_element_type=jnp.float32)
             + bg_ref[...])              # (B, 4H)

    s = _sigmoid_exact(gates)            # sigmoid over the full (B, 4H) slab
    i_g = s[:, 0 * H:1 * H]
    f_g = s[:, 1 * H:2 * H]
    o_g = s[:, 3 * H:4 * H]
    g_g = jnp.tanh(gates[:, 2 * H:3 * H])

    c_new = f_g * c + i_g * g_g
    h_new = o_g * jnp.tanh(c_new)

    # MLP head: wm_ref/bm_ref are zero-padded to 128 output lanes (real
    # columns [0:I]) -> lane-dense (B, 128) result, one unmasked store.
    y = _sigmoid_exact(
        jnp.dot(h_new, wm_ref[...], preferred_element_type=jnp.float32)
        + bm_ref[...])

    y_ref[0] = y                         # dense per-step output store
    h_scr[...] = h_new                   # carry state to next grid step
    c_scr[...] = c_new

    # Finalize: write final hidden state once, on the last step.
    @pl.when(t == last)
    def _():
        hT_ref[...] = h_new
        cT_ref[...] = c_new


def _round_up(n, m):
    return ((n + m - 1) // m) * m


def prepare_params(w_ih, w_hh, b_ih, b_hh, w_mlp, b_mlp):
    """One-time layout prep (done at init, NOT per call):
    transpose gate weights, fold gate biases, lane-pad the MLP head."""
    I = w_ih.shape[1]
    H = w_hh.shape[1]
    P = _round_up(I, 128)                                   # lane-dense y width
    w_ih_t = jnp.asarray(w_ih.T, jnp.float32)               # (I, 4H)
    w_hh_t = jnp.asarray(w_hh.T, jnp.float32)               # (H, 4H)
    b_gates = jnp.asarray(b_ih + b_hh, jnp.float32).reshape(1, -1)   # (1, 4H)
    w_mlp_pad = jnp.zeros((H, P), jnp.float32).at[:, :I].set(w_mlp.T)
    b_mlp_pad = jnp.zeros((1, P), jnp.float32).at[:, :I].set(b_mlp)
    return w_ih_t, w_hh_t, b_gates, w_mlp_pad, b_mlp_pad


@jax.jit
def lstm_forward(x_seq, h0, c0, w_ih_t, w_hh_t, b_gates, w_mlp_pad, b_mlp_pad):
    """x_seq: (T, B, I); h0/c0: (B, H); params from prepare_params().
    Runs T LSTM steps (== T calls of the module's forward) in ONE kernel.
    Returns (y_seq (T, B, I), h_T (B, H), c_T (B, H))."""
    T, B, I = x_seq.shape
    H = h0.shape[-1]
    P = w_mlp_pad.shape[-1]

    def const_spec(shape):
        # Block == full array, same block every grid step -> stays resident.
        return pl.BlockSpec(shape, lambda t: (0,) * len(shape))

    y_pad, h_T, c_T = pl.pallas_call(
        lstm_seq_kernel,
        out_shape=(
            jax.ShapeDtypeStruct((T, B, P), jnp.float32),
            jax.ShapeDtypeStruct((B, H), jnp.float32),
            jax.ShapeDtypeStruct((B, H), jnp.float32),
        ),
        grid=(T,),
        in_specs=[
            pl.BlockSpec((1, B, I), lambda t: (t, 0, 0)),   # x_t streamed
            const_spec((B, H)),                             # h0
            const_spec((B, H)),                             # c0
            const_spec((I, 4 * H)),                         # W_ih^T  (resident)
            const_spec((H, 4 * H)),                         # W_hh^T  (resident)
            const_spec((1, 4 * H)),                         # folded gate bias
            const_spec((H, P)),                             # W_mlp^T (lane-padded)
            const_spec((1, P)),                             # b_mlp   (lane-padded)
        ],
        out_specs=(
            pl.BlockSpec((1, B, P), lambda t: (t, 0, 0)),   # per-step y slab
            const_spec((B, H)),                             # final h
            const_spec((B, H)),                             # final c
        ),
        scratch_shapes=[
            pltpu.VMEM((B, H), jnp.float32),                # h state
            pltpu.VMEM((B, H), jnp.float32),                # c state
        ],
        compiler_params=pltpu.CompilerParams(
            dimension_semantics=("arbitrary",)),            # time recurrence
    )(x_seq, h0, c0, w_ih_t, w_hh_t, b_gates, w_mlp_pad, b_mlp_pad)

    return y_pad[:, :, :I], h_T, c_T


def xavier_normal(key, shape):
    # PyTorch xavier_normal for a 2D weight of shape (fan_out, fan_in)
    fan_out, fan_in = shape
    std = math.sqrt(2.0 / (fan_in + fan_out))
    return std * jax.random.normal(key, shape, dtype=jnp.float32)


def reference_step(x, h, c, w_ih, w_hh, b_ih, b_hh, w_mlp, b_mlp):
    """Pure-JAX equivalent of one call of the PyTorch module's forward()."""
    H = h.shape[-1]
    gates = x @ w_ih.T + h @ w_hh.T + b_ih + b_hh
    i_g = jax.nn.sigmoid(gates[:, 0 * H:1 * H])
    f_g = jax.nn.sigmoid(gates[:, 1 * H:2 * H])
    g_g = jnp.tanh(gates[:, 2 * H:3 * H])
    o_g = jax.nn.sigmoid(gates[:, 3 * H:4 * H])
    c_new = f_g * c + i_g * g_g
    h_new = o_g * jnp.tanh(c_new)
    y = jax.nn.sigmoid(h_new @ w_mlp.T + b_mlp)
    return y, h_new, c_new


if __name__ == "__main__":
    B, I, H, T = 8, 16, 32, 8   # batch, num_inputs, num_hidden, timesteps

    key = jax.random.PRNGKey(0)
    k_x, k_h, k_c, k_wih, k_whh, k_wmlp = jax.random.split(key, 6)

    x_seq = jax.random.normal(k_x, (T, B, I), dtype=jnp.float32)
    h0 = jax.random.normal(k_h, (B, H), dtype=jnp.float32)   # init_hidden: randn
    c0 = jax.random.normal(k_c, (B, H), dtype=jnp.float32)

    # Parameters (module init: xavier_normal weights, zero biases).
    w_ih = xavier_normal(k_wih, (4 * H, I))
    w_hh = xavier_normal(k_whh, (4 * H, H))
    b_ih = jnp.zeros((4 * H,), jnp.float32)
    b_hh = jnp.zeros((4 * H,), jnp.float32)
    w_mlp = xavier_normal(k_wmlp, (I, H))
    b_mlp = jnp.zeros((I,), jnp.float32)

    params = prepare_params(w_ih, w_hh, b_ih, b_hh, w_mlp, b_mlp)

    y_seq, h_T, c_T = lstm_forward(x_seq, h0, c0, *params)
    jax.block_until_ready((y_seq, h_T, c_T))

    # Reference: module.forward() applied T times with persistent hidden state.
    h_r, c_r = h0, c0
    ys = []
    for t in range(T):
        y_t, h_r, c_r = reference_step(x_seq[t], h_r, c_r,
                                       w_ih, w_hh, b_ih, b_hh, w_mlp, b_mlp)
        ys.append(y_t)
    y_ref = jnp.stack(ys, axis=0)

    # Exact sigmoid (tanh identity), no approx reciprocal -> tight tolerance.
    assert jnp.allclose(y_seq, y_ref, atol=1e-4, rtol=1e-4), "y mismatch"
    assert jnp.allclose(h_T, h_r, atol=1e-4, rtol=1e-4), "h mismatch"
    assert jnp.allclose(c_T, c_r, atol=1e-4, rtol=1e-4), "c mismatch"

    print("KERNEL_OK")
</pallas_src>

<mosaic_0001>
module attributes {stable_mosaic.version = 11 : i64} {
  func.func @lstm_seq_kernel(%arg0: i32, %arg1: memref<1x8x16xf32, #tpu.memory_space<vmem>>, %arg2: memref<8x32xf32, #tpu.memory_space<vmem>>, %arg3: memref<8x32xf32, #tpu.memory_space<vmem>>, %arg4: memref<16x128xf32, #tpu.memory_space<vmem>>, %arg5: memref<32x128xf32, #tpu.memory_space<vmem>>, %arg6: memref<1x128xf32, #tpu.memory_space<vmem>>, %arg7: memref<32x128xf32, #tpu.memory_space<vmem>>, %arg8: memref<1x128xf32, #tpu.memory_space<vmem>>, %arg9: memref<1x8x128xf32, #tpu.memory_space<vmem>>, %arg10: memref<8x32xf32, #tpu.memory_space<vmem>>, %arg11: memref<8x32xf32, #tpu.memory_space<vmem>>, %arg12: memref<8x32xf32, #tpu.memory_space<vmem>>, %arg13: memref<8x32xf32, #tpu.memory_space<vmem>>) attributes {dimension_semantics = [#tpu.dimension_semantics<arbitrary>], iteration_bounds = array<i64: 8>, scalar_prefetch = 0 : i64, scratch_operands = 2 : i64, tpu.core_type = #tpu.core_type<tc>, window_params = [{transform_indices = @transform_0, window_bounds = array<i64: 1, 8, 16>}, {pipeline_mode = #tpu.pipeline_mode<synchronous>, transform_indices = @transform_1, window_bounds = array<i64: 8, 32>}, {pipeline_mode = #tpu.pipeline_mode<synchronous>, transform_indices = @transform_2, window_bounds = array<i64: 8, 32>}, {pipeline_mode = #tpu.pipeline_mode<synchronous>, transform_indices = @transform_3, window_bounds = array<i64: 16, 128>}, {pipeline_mode = #tpu.pipeline_mode<synchronous>, transform_indices = @transform_4, window_bounds = array<i64: 32, 128>}, {pipeline_mode = #tpu.pipeline_mode<synchronous>, transform_indices = @transform_5, window_bounds = array<i64: 1, 128>}, {pipeline_mode = #tpu.pipeline_mode<synchronous>, transform_indices = @transform_6, window_bounds = array<i64: 32, 128>}, {pipeline_mode = #tpu.pipeline_mode<synchronous>, transform_indices = @transform_7, window_bounds = array<i64: 1, 128>}, {transform_indices = @transform_8, window_bounds = array<i64: 1, 8, 128>}, {pipeline_mode = #tpu.pipeline_mode<synchronous>, transform_indices = @transform_9, window_bounds = array<i64: 8, 32>}, {pipeline_mode = #tpu.pipeline_mode<synchronous>, transform_indices = @transform_10, window_bounds = array<i64: 8, 32>}]} {
    %c0_i32 = arith.constant 0 : i32
    %0 = arith.cmpi eq, %arg0, %c0_i32 : i32
    %1 = arith.extui %0 : i1 to i32
    %c0_i32_0 = arith.constant 0 : i32
    %2 = arith.cmpi ne, %1, %c0_i32_0 : i32
    scf.if %2 {
      %c0_33 = arith.constant 0 : index
      %c0_34 = arith.constant 0 : index
      %52 = vector.load %arg2[%c0_33, %c0_34] : memref<8x32xf32, #tpu.memory_space<vmem>>, vector<8x32xf32>
      %c0_35 = arith.constant 0 : index
      %c0_36 = arith.constant 0 : index
      %53 = vector.load %arg12[%c0_35, %c0_36] : memref<8x32xf32, #tpu.memory_space<vmem>>, vector<8x32xf32>
      tpu.vector_store %arg12[%c0_35, %c0_36], %52 {strides = array<i32>} : memref<8x32xf32, #tpu.memory_space<vmem>>, vector<8x32xf32>,
      %c0_37 = arith.constant 0 : index
      %c0_38 = arith.constant 0 : index
      %54 = vector.load %arg3[%c0_37, %c0_38] : memref<8x32xf32, #tpu.memory_space<vmem>>, vector<8x32xf32>
      %c0_39 = arith.constant 0 : index
      %c0_40 = arith.constant 0 : index
      %55 = vector.load %arg13[%c0_39, %c0_40] : memref<8x32xf32, #tpu.memory_space<vmem>>, vector<8x32xf32>
      tpu.vector_store %arg13[%c0_39, %c0_40], %54 {strides = array<i32>} : memref<8x32xf32, #tpu.memory_space<vmem>>, vector<8x32xf32>,
    } else {
    }
    %c0 = arith.constant 0 : index
    %c0_1 = arith.constant 0 : index
    %3 = vector.load %arg12[%c0, %c0_1] : memref<8x32xf32, #tpu.memory_space<vmem>>, vector<8x32xf32>
    %c0_2 = arith.constant 0 : index
    %c0_3 = arith.constant 0 : index
    %4 = vector.load %arg13[%c0_2, %c0_3] : memref<8x32xf32, #tpu.memory_space<vmem>>, vector<8x32xf32>
    %c0_4 = arith.constant 0 : index
    %c0_5 = arith.constant 0 : index
    %c0_6 = arith.constant 0 : index
    %5 = vector.load %arg1[%c0_4, %c0_5, %c0_6] : memref<1x8x16xf32, #tpu.memory_space<vmem>>, vector<1x8x16xf32>
    %6 = vector.shape_cast %5 : vector<1x8x16xf32> to vector<8x16xf32>
    %c0_7 = arith.constant 0 : index
    %c0_8 = arith.constant 0 : index
    %7 = vector.load %arg4[%c0_7, %c0_8] : memref<16x128xf32, #tpu.memory_space<vmem>>, vector<16x128xf32>
    %cst = arith.constant dense<0.000000e+00> : vector<8x128xf32>
    %8 = tpu.matmul %6, %7, %cst {dimension_numbers = #tpu.dot_dimension_numbers<[1], [0], [0], [1], [0, 0, 1, 1], [], []>} : vector<8x16xf32>, vector<16x128xf32>, vector<8x128xf32> -> vector<8x128xf32>
    %c0_9 = arith.constant 0 : index
    %c0_10 = arith.constant 0 : index
    %9 = vector.load %arg5[%c0_9, %c0_10] : memref<32x128xf32, #tpu.memory_space<vmem>>, vector<32x128xf32>
    %cst_11 = arith.constant dense<0.000000e+00> : vector<8x128xf32>
    %10 = tpu.matmul %3, %9, %cst_11 {dimension_numbers = #tpu.dot_dimension_numbers<[1], [0], [0], [1], [0, 0, 1, 1], [], []>} : vector<8x32xf32>, vector<32x128xf32>, vector<8x128xf32> -> vector<8x128xf32>
    %11 = arith.addf %8, %10 : vector<8x128xf32>
    %c0_12 = arith.constant 0 : index
    %c0_13 = arith.constant 0 : index
    %12 = vector.load %arg6[%c0_12, %c0_13] : memref<1x128xf32, #tpu.memory_space<vmem>>, vector<1x128xf32>
    %13 = vector.broadcast %12 : vector<1x128xf32> to vector<8x128xf32>
    %14 = arith.addf %11, %13 : vector<8x128xf32>
    %cst_14 = arith.constant 5.000000e-01 : f32
    %15 = vector.broadcast %cst_14 : f32 to vector<8x128xf32>
    %16 = arith.mulf %15, %14 : vector<8x128xf32>
    %17 = math.tanh %16 : vector<8x128xf32>
    %cst_15 = arith.constant 1.000000e+00 : f32
    %18 = vector.broadcast %cst_15 : f32 to vector<8x128xf32>
    %19 = arith.addf %17, %18 : vector<8x128xf32>
    %cst_16 = arith.constant 5.000000e-01 : f32
    %20 = vector.broadcast %cst_16 : f32 to vector<8x128xf32>
    %21 = arith.mulf %20, %19 : vector<8x128xf32>
    %22 = vector.extract_strided_slice %21 {offsets = [0, 0], sizes = [8, 32], strides = [1, 1]} : vector<8x128xf32> to vector<8x32xf32>
    %23 = vector.extract_strided_slice %21 {offsets = [0, 32], sizes = [8, 32], strides = [1, 1]} : vector<8x128xf32> to vector<8x32xf32>
    %24 = vector.extract_strided_slice %21 {offsets = [0, 96], sizes = [8, 32], strides = [1, 1]} : vector<8x128xf32> to vector<8x32xf32>
    %25 = vector.extract_strided_slice %14 {offsets = [0, 64], sizes = [8, 32], strides = [1, 1]} : vector<8x128xf32> to vector<8x32xf32>
    %26 = math.tanh %25 : vector<8x32xf32>
    %27 = arith.mulf %23, %4 : vector<8x32xf32>
    %28 = arith.mulf %22, %26 : vector<8x32xf32>
    %29 = arith.addf %27, %28 : vector<8x32xf32>
    %30 = math.tanh %29 : vector<8x32xf32>
    %31 = arith.mulf %24, %30 : vector<8x32xf32>
    %c0_17 = arith.constant 0 : index
    %c0_18 = arith.constant 0 : index
    %32 = vector.load %arg7[%c0_17, %c0_18] : memref<32x128xf32, #tpu.memory_space<vmem>>, vector<32x128xf32>
    %cst_19 = arith.constant dense<0.000000e+00> : vector<8x128xf32>
    %33 = tpu.matmul %31, %32, %cst_19 {dimension_numbers = #tpu.dot_dimension_numbers<[1], [0], [0], [1], [0, 0, 1, 1], [], []>} : vector<8x32xf32>, vector<32x128xf32>, vector<8x128xf32> -> vector<8x128xf32>
    %c0_20 = arith.constant 0 : index
    %c0_21 = arith.constant 0 : index
    %34 = vector.load %arg8[%c0_20, %c0_21] : memref<1x128xf32, #tpu.memory_space<vmem>>, vector<1x128xf32>
    %35 = vector.broadcast %34 : vector<1x128xf32> to vector<8x128xf32>
    %36 = arith.addf %33, %35 : vector<8x128xf32>
    %cst_22 = arith.constant 5.000000e-01 : f32
    %37 = vector.broadcast %cst_22 : f32 to vector<8x128xf32>
    %38 = arith.mulf %37, %36 : vector<8x128xf32>
    %39 = math.tanh %38 : vector<8x128xf32>
    %cst_23 = arith.constant 1.000000e+00 : f32
    %40 = vector.broadcast %cst_23 : f32 to vector<8x128xf32>
    %41 = arith.addf %39, %40 : vector<8x128xf32>
    %cst_24 = arith.constant 5.000000e-01 : f32
    %42 = vector.broadcast %cst_24 : f32 to vector<8x128xf32>
    %43 = arith.mulf %42, %41 : vector<8x128xf32>
    %c0_25 = arith.constant 0 : index
    %c0_26 = arith.constant 0 : index
    %c0_27 = arith.constant 0 : index
    %44 = vector.load %arg9[%c0_25, %c0_26, %c0_27] : memref<1x8x128xf32, #tpu.memory_space<vmem>>, vector<1x8x128xf32>
    %45 = vector.shape_cast %44 : vector<1x8x128xf32> to vector<8x128xf32>
    %46 = vector.shape_cast %43 : vector<8x128xf32> to vector<1x8x128xf32>
    tpu.vector_store %arg9[%c0_25, %c0_26, %c0_27], %46 {strides = array<i32>} : memref<1x8x128xf32, #tpu.memory_space<vmem>>, vector<1x8x128xf32>,
    %c0_28 = arith.constant 0 : index
    %c0_29 = arith.constant 0 : index
    %47 = vector.load %arg12[%c0_28, %c0_29] : memref<8x32xf32, #tpu.memory_space<vmem>>, vector<8x32xf32>
    tpu.vector_store %arg12[%c0_28, %c0_29], %31 {strides = array<i32>} : memref<8x32xf32, #tpu.memory_space<vmem>>, vector<8x32xf32>,
    %c0_30 = arith.constant 0 : index
    %c0_31 = arith.constant 0 : index
    %48 = vector.load %arg13[%c0_30, %c0_31] : memref<8x32xf32, #tpu.memory_space<vmem>>, vector<8x32xf32>
    tpu.vector_store %arg13[%c0_30, %c0_31], %29 {strides = array<i32>} : memref<8x32xf32, #tpu.memory_space<vmem>>, vector<8x32xf32>,
    %c7_i32 = arith.constant 7 : i32
    %49 = arith.cmpi eq, %arg0, %c7_i32 : i32
    %50 = arith.extui %49 : i1 to i32
    %c0_i32_32 = arith.constant 0 : i32
    %51 = arith.cmpi ne, %50, %c0_i32_32 : i32
    scf.if %51 {
      %c0_33 = arith.constant 0 : index
      %c0_34 = arith.constant 0 : index
      %52 = vector.load %arg10[%c0_33, %c0_34] : memref<8x32xf32, #tpu.memory_space<vmem>>, vector<8x32xf32>
      tpu.vector_store %arg10[%c0_33, %c0_34], %31 {strides = array<i32>} : memref<8x32xf32, #tpu.memory_space<vmem>>, vector<8x32xf32>,
      %c0_35 = arith.constant 0 : index
      %c0_36 = arith.constant 0 : index
      %53 = vector.load %arg11[%c0_35, %c0_36] : memref<8x32xf32, #tpu.memory_space<vmem>>, vector<8x32xf32>
      tpu.vector_store %arg11[%c0_35, %c0_36], %29 {strides = array<i32>} : memref<8x32xf32, #tpu.memory_space<vmem>>, vector<8x32xf32>,
    } else {
    }
    return
  }
  func.func @transform_0(%arg0: i32) -> (i32, i32, i32) {
    %c0_i32 = arith.constant 0 : i32
    %c0_i32_0 = arith.constant 0 : i32
    %c0_i32_1 = arith.constant 0 : i32
    return %arg0, %c0_i32, %c0_i32_0 : i32, i32, i32
  }
  func.func @transform_1(%arg0: i32) -> (i32, i32) {
    %c0_i32 = arith.constant 0 : i32
    %c0_i32_0 = arith.constant 0 : i32
    %c0_i32_1 = arith.constant 0 : i32
    return %c0_i32, %c0_i32_0 : i32, i32
  }
  func.func @transform_2(%arg0: i32) -> (i32, i32) {
    %c0_i32 = arith.constant 0 : i32
    %c0_i32_0 = arith.constant 0 : i32
    %c0_i32_1 = arith.constant 0 : i32
    return %c0_i32, %c0_i32_0 : i32, i32
  }
  func.func @transform_3(%arg0: i32) -> (i32, i32) {
    %c0_i32 = arith.constant 0 : i32
    %c0_i32_0 = arith.constant 0 : i32
    %c0_i32_1 = arith.constant 0 : i32
    return %c0_i32, %c0_i32_0 : i32, i32
  }
  func.func @transform_4(%arg0: i32) -> (i32, i32) {
    %c0_i32 = arith.constant 0 : i32
    %c0_i32_0 = arith.constant 0 : i32
    %c0_i32_1 = arith.constant 0 : i32
    return %c0_i32, %c0_i32_0 : i32, i32
  }
  func.func @transform_5(%arg0: i32) -> (i32, i32) {
    %c0_i32 = arith.constant 0 : i32
    %c0_i32_0 = arith.constant 0 : i32
    %c0_i32_1 = arith.constant 0 : i32
    return %c0_i32, %c0_i32_0 : i32, i32
  }
  func.func @transform_6(%arg0: i32) -> (i32, i32) {
    %c0_i32 = arith.constant 0 : i32
    %c0_i32_0 = arith.constant 0 : i32
    %c0_i32_1 = arith.constant 0 : i32
    return %c0_i32, %c0_i32_0 : i32, i32
  }
  func.func @transform_7(%arg0: i32) -> (i32, i32) {
    %c0_i32 = arith.constant 0 : i32
    %c0_i32_0 = arith.constant 0 : i32
    %c0_i32_1 = arith.constant 0 : i32
    return %c0_i32, %c0_i32_0 : i32, i32
  }
  func.func @transform_8(%arg0: i32) -> (i32, i32, i32) {
    %c0_i32 = arith.constant 0 : i32
    %c0_i32_0 = arith.constant 0 : i32
    %c0_i32_1 = arith.constant 0 : i32
    return %arg0, %c0_i32, %c0_i32_0 : i32, i32, i32
  }
  func.func @transform_9(%arg0: i32) -> (i32, i32) {
    %c0_i32 = arith.constant 0 : i32
    %c0_i32_0 = arith.constant 0 : i32
    %c0_i32_1 = arith.constant 0 : i32
    return %c0_i32, %c0_i32_0 : i32, i32
  }
  func.func @transform_10(%arg0: i32) -> (i32, i32) {
    %c0_i32 = arith.constant 0 : i32
    %c0_i32_0 = arith.constant 0 : i32
    %c0_i32_1 = arith.constant 0 : i32
    return %c0_i32, %c0_i32_0 : i32, i32
  }
}

</mosaic_0001>

<bundles_post_ra>
// kernel: lstm_forward.1
= control target key start
LH: loop header
LB: loop body
LE: loop exit
PB: predicated region body
PF: predicated region fallthrough
CT: control target
= control target key end

     0   :  { %s1878_s0 = inlined_call_operand.hbm [shape: f32[8,8,16], index: 0, kind: input, shape index: {}]   ;;  %s1879_s1 = inlined_call_operand.hbm [shape: f32[8,32], index: 1, kind: input, shape index: {}]   ;;  %s1880_s2 = inlined_call_operand.hbm [shape: f32[8,32], index: 2, kind: input, shape index: {}]   ;;  %s1881_s3 = inlined_call_operand.hbm [shape: f32[16,128], index: 3, kind: input, shape index: {}]   ;;  %s1882_s4 = inlined_call_operand.hbm [shape: f32[32,128], index: 4, kind: input, shape index: {}]   ;;  %s1883_s5 = inlined_call_operand.vmem [shape: f32[1,128], index: 5, kind: input, shape index: {}]   ;;  %s1884_s6 = inlined_call_operand.hbm [shape: f32[32,128], index: 6, kind: input, shape index: {}]   ;;  %s1885_s7 = inlined_call_operand.vmem [shape: f32[1,128], index: 7, kind: input, shape index: {}]   ;;  %s1886_s8 = inlined_call_operand.hbm [shape: f32[8,8,128], index: 8, kind: output, shape index: {0}]   ;;  %s1887_s9 = inlined_call_operand.hbm [shape: f32[8,32], index: 9, kind: output, shape index: {1}]   ;;  %s1888_s10 = inlined_call_operand.hbm [shape: f32[8,32], index: 10, kind: output, shape index: {2}]  }
   0x1   :  { %1897 = sst [smem:[#allocation25_spill]] %s1879_s1 }
   0x2   :  { %1898 = sst [smem:[#allocation26_spill]] %s1880_s2 }
   0x3   :  { %16 = vsyncpa [#allocation5], 0 }
   0x4   :  { %18 = vsyncpa [#allocation5 + $0x1], 0 }
   0x5   :  { %19 = vsyncpa [#allocation8], 0 }
   0x6   :  { %20 = vsyncpa [#allocation11], 0 }
   0x7   :  { %21 = vsyncpa [#allocation14], 0 }
   0x8   :  { %22 = vsyncpa [#allocation6], 0 }
   0x9   :  { %24 = vsyncpa [#allocation6 + $0x1], 0 }
   0xa   :  { %25 = vsyncpa [#allocation17], 0  ;;  %s1514_s13 = smov 0   ;;  %s1516_s14 = smov 0  }
   0xb   :  { %s1518_s15 = smov 0   ;;  %s1520_s16 = smov 0  }
   0xc LB: > { %s1442_s17 = smov [#allocation7]   ;;  %s1535_s19 = sadd.s32 4294967295, %s1440_s16   ;;  %s1440_s16 = sphi %s1520_s16, %s1932_s16   ;;  %s1436_s15 = sphi %s1518_s15, %s1931_s15   ;;  %s1432_s14 = sphi %s1516_s14, %s1930_s14   ;;  %s1428_s13 = sphi %s1514_s13, %s1929_s13  }
   0xd   : > { %s290_s18 = sshll.u32 %s1442_s17, 4  ;;  %p920_p0 = scmp.ge.s32.totalorder %s1440_s16, 1  ;;  %s291_s18 = int_to_ptr.vmem [resolvable:$true] %s290_s18 }
   0xe   : > { %p1889_p1 = scmp.eq.s32.totalorder %s1535_s19, 0  ;;  %p277_p2 = scmp.lt.s32.totalorder %s1440_s16, 9 }
   0xf   : > { %s1443_s21 = smov [#allocation10]   ;;  %s1444_s24 = smov [#allocation9]  }
  0x10   : > { %p1541_p4 = pnand %p920_p0, %p277_p2  ;;  %s311_s22 = sshll.u32 %s1443_s21, 4  ;;  %s1547_s22 = int_to_ptr.vmem [resolvable:$true] %s311_s22 }
  0x11   : > { %s301_s25 = sshll.u32 %s1444_s24, 4  ;;  %s1901_s1 = sld [smem:[#allocation25_spill]]  ;;  %s1555_s25 = int_to_ptr.vmem [resolvable:$true] %s301_s25 }
  0x12   : > { %s1899_s20 = scalar_select %p1541_p4, 1, 0 }
  0x13   : > { %p1041_p5 = pneg %p1541_p4 }
  0x15   : > { %p1551_p6 = pnand %p1041_p5, %p1889_p1 }
  0x17   : > { %s1136_s28 = scalar_lea.hbm %s1901_s1, 128  ;;  %p1565_p8 = pneg %p1551_p6 }
  0x18   : > { %p1137_p7 = scmp.ne.s32.totalorder %s1901_s1, %s1136_s28  ;;  %p1143_p11 = scmp.lt.u32.totalorder %s1136_s28, %s1901_s1 }
  0x1a   : > { %p1139_p9 = pnand %p1565_p8, %p1137_p7 }
  0x1c   : > { %p1140_p10 = pneg %p1139_p9 }
  0x1e   : > { %p1145_p12 = pnand %p1143_p11, %p1140_p10 }
  0x20   : > { %1148 = shalt.err (!%p1145_p12)
}
  0x21   : > { %s1149_s21 = scalar_lea.vmem %s291_s18, 128  ;;  %p1157_p5 = scmp.lt.s32.totalorder %s291_s18, %s291_s18 }
  0x22   : > { %p1150_p13 = scmp.ne.s32.totalorder %s291_s18, %s1149_s21  ;;  %p1158_p3 = scmp.lt.s32.totalorder %s1149_s21, %s1149_s21 }
  0x24   : > { %p1152_p0 = pnand %p1150_p13, %p1565_p8  ;;  %p1159_p1 = por %p1158_p3, %p1157_p5 }
  0x26   : > { %p1153_p2 = pneg %p1152_p0 }
  0x28   : > { %p1160_p4 = pnand %p1159_p1, %p1153_p2 }
  0x2a   : > { %1163 = shalt.err (!%p1160_p4)
}
  0x2b   : > { %1044 = dma.hbm_to_vmem [thread:$0]  (!%p1551_p6), %s1901_s1, 128, %s291_s18, [#allocation8]  }
  0x2c   : > { %s1164_s29 = scalar_lea.hbm %s1881_s3, 256 }
  0x2d   : > { %p1165_p7 = scmp.ne.s32.totalorder %s1881_s3, %s1164_s29  ;;  %p1171_p1 = scmp.lt.u32.totalorder %s1164_s29, %s1881_s3 }
  0x2f   : > { %p1167_p9 = pnand %p1165_p7, %p1565_p8 }
  0x31   : > { %p1168_p3 = pneg %p1167_p9 }
  0x33   : > { %p1173_p4 = pnand %p1171_p1, %p1168_p3 }
  0x35   : > { %1176 = shalt.err (!%p1173_p4)
}
  0x36   : > { %s1177_s18 = scalar_lea.vmem %s1547_s22, 256  ;;  %p1185_p13 = scmp.lt.s32.totalorder %s1547_s22, %s1547_s22 }
  0x37   : > { %p1178_p10 = scmp.ne.s32.totalorder %s1547_s22, %s1177_s18  ;;  %p1186_p0 = scmp.lt.s32.totalorder %s1177_s18, %s1177_s18 }
  0x39   : > { %p1180_p11 = pnand %p1178_p10, %p1565_p8  ;;  %p1187_p2 = por %p1186_p0, %p1185_p13 }
  0x3b   : > { %p1181_p12 = pneg %p1180_p11 }
  0x3d   : > { %p1188_p5 = pnand %p1187_p2, %p1181_p12 }
  0x3f   : > { %1191 = shalt.err (!%p1188_p5)
}
  0x40   : > { %s1891_s24 = smov 128   ;;  %s1893_s26 = smov 8  }
  0x41   : > { %1050 = dma.hbm_to_vmem [thread:$0]  (!%p1551_p6), %s1881_s3, 256, %s1547_s22, [#allocation11], %s1891_s24, %s1891_s24, %s1893_s26  }
  0x42   : > { %s1903_s2 = sld [smem:[#allocation26_spill]] }
  0x48   : > { %s1192_s12 = scalar_lea.hbm %s1903_s2, 128 }
  0x49   : > { %p1193_p7 = scmp.ne.s32.totalorder %s1903_s2, %s1192_s12  ;;  %p1199_p1 = scmp.lt.u32.totalorder %s1192_s12, %s1903_s2 }
  0x4b   : > { %p1195_p9 = pnand %p1193_p7, %p1565_p8 }
  0x4d   : > { %p1196_p3 = pneg %p1195_p9 }
  0x4f   : > { %p1201_p4 = pnand %p1199_p1, %p1196_p3 }
  0x51   : > { %1204 = shalt.err (!%p1201_p4)
}
  0x52   : > { %s1205_s22 = scalar_lea.vmem %s1555_s25, 128  ;;  %p1213_p13 = scmp.lt.s32.totalorder %s1555_s25, %s1555_s25 }
  0x53   : > { %p1206_p10 = scmp.ne.s32.totalorder %s1555_s25, %s1205_s22  ;;  %p1214_p0 = scmp.lt.s32.totalorder %s1205_s22, %s1205_s22 }
  0x55   : > { %p1208_p11 = pnand %p1206_p10, %p1565_p8  ;;  %p1215_p2 = por %p1214_p0, %p1213_p13 }
  0x57   : > { %p1209_p12 = pneg %p1208_p11 }
  0x59   : > { %p1216_p5 = pnand %p1215_p2, %p1209_p12 }
  0x5b   : > { %1219 = shalt.err (!%p1216_p5)
}
  0x5c   : > { %1047 = dma.hbm_to_vmem [thread:$0]  (!%p1551_p6), %s1903_s2, 128, %s1555_s25, [#allocation8]  }
  0x5d   : > { %s1447_s28 = smov [#allocation12]   ;;  %s1448_s30 = smov [#allocation13]  }
  0x5e   : > { %s324_s29 = sshll.u32 %s1447_s28, 4  ;;  %s340_s12 = sshll.u32 %s1448_s30, 4  ;;  %s325_s29 = int_to_ptr.vmem [resolvable:$true] %s324_s29  ;;  %s341_s12 = int_to_ptr.vmem [resolvable:$true] %s340_s12 }
  0x5f   : > { %s1220_s18 = scalar_lea.hbm %s1882_s4, 512 }
  0x60   : > { %p1221_p7 = scmp.ne.s32.totalorder %s1882_s4, %s1220_s18  ;;  %p1227_p1 = scmp.lt.u32.totalorder %s1220_s18, %s1882_s4 }
  0x62   : > { %p1223_p9 = pnand %p1221_p7, %p1565_p8 }
  0x64   : > { %p1224_p3 = pneg %p1223_p9 }
  0x66   : > { %p1229_p4 = pnand %p1227_p1, %p1224_p3 }
  0x68   : > { %1232 = shalt.err (!%p1229_p4)
}
  0x69   : > { %s1233_s25 = scalar_lea.vmem %s325_s29, 512  ;;  %p1241_p13 = scmp.lt.s32.totalorder %s325_s29, %s325_s29 }
  0x6a   : > { %p1234_p10 = scmp.ne.s32.totalorder %s325_s29, %s1233_s25  ;;  %p1242_p0 = scmp.lt.s32.totalorder %s1233_s25, %s1233_s25 }
  0x6c   : > { %p1236_p11 = pnand %p1234_p10, %p1565_p8  ;;  %p1243_p2 = por %p1242_p0, %p1241_p13 }
  0x6e   : > { %p1237_p12 = pneg %p1236_p11 }
  0x70   : > { %p1244_p5 = pnand %p1243_p2, %p1237_p12 }
  0x72   : > { %1247 = shalt.err (!%p1244_p5)
}
  0x73   : > { %s1904_s24 = smov 8   ;;  %s1905_s27 = smov 128  }
  0x74   : > { %1053 = dma.hbm_to_vmem [thread:$0]  (!%p1551_p6), %s1882_s4, 512, %s325_s29, [#allocation11], %s1905_s27, %s1905_s27, %s1904_s24  }
  0x75   : > { %s1248_s21 = scalar_lea.hbm %s1884_s6, 512 }
  0x76   : > { %p1249_p7 = scmp.ne.s32.totalorder %s1884_s6, %s1248_s21  ;;  %p1255_p1 = scmp.lt.u32.totalorder %s1248_s21, %s1884_s6 }
  0x78   : > { %p1251_p9 = pnand %p1249_p7, %p1565_p8 }
  0x7a   : > { %p1252_p3 = pneg %p1251_p9 }
  0x7c   : > { %p1257_p4 = pnand %p1255_p1, %p1252_p3 }
  0x7e   : > { %1260 = shalt.err (!%p1257_p4)
}
  0x7f   : > { %s1261_s26 = scalar_lea.vmem %s341_s12, 512  ;;  %p1269_p13 = scmp.lt.s32.totalorder %s341_s12, %s341_s12 }
  0x80   : > { %p1262_p10 = scmp.ne.s32.totalorder %s341_s12, %s1261_s26  ;;  %p1270_p0 = scmp.lt.s32.totalorder %s1261_s26, %s1261_s26 }
  0x82   : > { %p1264_p11 = pnand %p1262_p10, %p1565_p8  ;;  %p1271_p2 = por %p1270_p0, %p1269_p13 }
  0x84   : > { %p1265_p12 = pneg %p1264_p11 }
  0x86   : > { %p1272_p5 = pnand %p1271_p2, %p1265_p12 }
  0x88   : > { %1275 = shalt.err (!%p1272_p5)
}
  0x89   : > { %1056 = dma.hbm_to_vmem [thread:$0]  (!%p1551_p6), %s1884_s6, 512, %s341_s12, [#allocation14], %s1905_s27, %s1905_s27, %s1904_s24  }
  0x8a   : > { %s919_s23 = sadd.s32 4294967294, %s1440_s16   ;;  %s1674_s11 = sadd.s32 1, %s1440_s16  }
  0x8b   : > { %s38_s30 = sadd.s32 1, %s1436_s15  ;;  %s35_s17 = ssub.s32 %s1440_s16, %s1674_s11 }
  0x8c   : > { %p45_p8 = scmp.ne.s32.totalorder %s1436_s15, %s1432_s14  ;;  %p36_p7 = scmp.eq.s32.totalorder %s35_s17, 0 }
  0x8d   : > { %p46_p9 = scmp.eq.s32.totalorder %s1440_s16, 0  ;;  %p51_p3 = scmp.ne.s32.totalorder %s1432_s14, %s1428_s13 }
  0x8e   : > { %p1895_p1 = scmp.eq.s32.totalorder %s1535_s19, 7  ;;  %p1906_p10 = scmp.eq.s32.totalorder %s1535_s19, 0 }
  0x8f   : > { %s1686_s21 = scalar_select %p36_p7, %s1436_s15, %s38_s30  }
  0x90   : > { %p47_p4 = por %p46_p9, %p45_p8  ;;  %p1690_p11 = por %p1906_p10, %p51_p3 }
  0x91   : > { %p1696_p6 = por %p1895_p1, %p45_p8  ;;  %p228_p12 = scmp.eq.s32.totalorder %s919_s23, 7 }
  0x92   : > { %p1070_p13 = scmp.lt.s32.totalorder %s1440_s16, 8  ;;  %s357_s24 = sand.u32 1, %s1436_s15  }
  0x93   : > { %s1908_s12 = scalar_select %p1696_p6, 1, 0 }
  0x94   : > { %p1702_p0 = por %p228_p12, %p51_p3  ;;  %s927_s22 = sshll.u32 %s357_s24, 3 }
  0x95   : > { %s928_s1 = sshll.u32 %s1440_s16, 7  ;;  %s361_s28 = scalar_lea.vmem [#allocation4], %s927_s22 }
  0x96   : > { %s1909_s27 = scalar_select %p1702_p0, 1, 0 }
  0x97   : > { %s1710_s29 = scalar_lea.hbm %s1878_s0, %s928_s1  ;;  %s368_s30 = sshll.u32 %s361_s28, 4  ;;  %s1716_s30 = int_to_ptr.vmem [resolvable:$true] %s368_s30 }
  0x98   : > { %p1712_p2 = pnand %p1070_p13, %p47_p4  ;;  %s358_s17 = scalar_lea.sflag [#allocation5], %s357_s24 }
  0x99   : > { %s1276_s2 = scalar_lea.hbm %s1710_s29, 128  ;;  %s1281_s25 = scalar_lea.hbm %s1878_s0, 1024 }
  0x9a   : > { %p1277_p5 = scmp.ne.s32.totalorder %s1710_s29, %s1276_s2  ;;  %p1278_p8 = pneg %p1712_p2 }
  0x9b   : > { %p1282_p3 = scmp.lt.u32.totalorder %s1710_s29, %s1878_s0  ;;  %p1283_p4 = scmp.lt.u32.totalorder %s1281_s25, %s1276_s2 }
  0x9c   : > { %p1279_p7 = pnand %p1278_p8, %p1277_p5  ;;  %p1285_p12 = scmp.lt.u32.totalorder %s1276_s2, %s1710_s29 }
  0x9d   : > { %p1284_p10 = por %p1283_p4, %p1282_p3 }
  0x9e   : > { %p1280_p9 = pneg %p1279_p7 }
  0x9f   : > { %p1286_p13 = por %p1285_p12, %p1284_p10 }
  0xa1   : > { %p1287_p1 = pnand %p1286_p13, %p1280_p9 }
  0xa3   : > { %1290 = shalt.err (!%p1287_p1)
}
  0xa4   : > { %s1291_s24 = scalar_lea.vmem %s1716_s30, 128  ;;  %s1449_s1 = smov [#allocation4]  }
  0xa5   : > { %p1292_p5 = scmp.ne.s32.totalorder %s1716_s30, %s1291_s24  ;;  %s1296_s22 = sshll.u32 %s1449_s1, 4  ;;  %s1297_s22 = int_to_ptr.vmem [resolvable:$false] %s1296_s22 }
  0xa6   : > { %s1298_s26 = scalar_lea.vmem %s1297_s22, 256  ;;  %p1299_p6 = scmp.lt.s32.totalorder %s1716_s30, %s1297_s22 }
  0xa7   : > { %p1294_p7 = pnand %p1292_p5, %p1278_p8  ;;  %p1300_p3 = scmp.lt.s32.totalorder %s1298_s26, %s1291_s24 }
  0xa9   : > { %p1295_p0 = pneg %p1294_p7  ;;  %p1301_p4 = por %p1300_p3, %p1299_p6 }
  0xab   : > { %p1302_p10 = pnand %p1301_p4, %p1295_p0 }
  0xad   : > { %1305 = shalt.err (!%p1302_p10)
}
  0xae   : > { %1060 = dma.hbm_to_vmem [thread:$0]  (!%p1712_p2), %s1710_s29, 128, %s1716_s30, %s358_s17  }
  0xaf   : > { %p1911_p1 = scmp.ne.s32.totalorder %s1899_s20, 0 }
  0xb0   : > { %s1746_s2 = sand.u32 (!%p1911_p1), 1, %s1432_s14  }
  0xb1   : > { %377 = sbr.rel (%p1911_p1) target bundleno = 1226 (0x4ca), region = 52  ;;  %s930_s25 = sshll.u32 (!%p1911_p1), %s1746_s2, 3 }
  0xb2   : > { %s380_s28 = scalar_lea.sflag (!%p1911_p1), [#allocation5], %s1746_s2  ;;  %s1750_s24 = scalar_lea.vmem (!%p1911_p1), [#allocation4], %s930_s25 }
  0xb8   : > { %1403 = dma.done.wait (%p1690_p11), %s380_s28, 128  }
  0xb9   : > { %1405 = vsyncadd (%p1690_p11), %s380_s28, 4294967168  ;;  %p1912_p6 = scmp.eq.s32.totalorder %s1535_s19, 0 }
  0xbb   : > { %1407 = dma.done.wait (%p1912_p6), [#allocation8], 256   ;;  %p1913_p0 = pmov %p1912_p6 }
  0xbd   : > { %1409 = vsyncadd (%p1913_p0), [#allocation8], 4294967040  ;;  %p1914_p2 = pmov %p1913_p0 }
  0xbe   : > { %p1915_p8 = pmov %p1913_p0 }
  0xbf   : > { %1411 = dma.done.wait (%p1914_p2), [#allocation11], 768  }
  0xc0   : > { %1413 = vsyncadd (%p1915_p8), [#allocation11], 4294966528  ;;  %p1916_p9 = pmov %p1913_p0 }
  0xc1   : > { %p1917_p12 = pmov %p1913_p0 }
  0xc2   : > { %1415 = dma.done.wait (%p1916_p9), [#allocation14], 512  }
  0xc3   : > { %1417 = vsyncadd (%p1917_p12), [#allocation14], 4294966784  ;;  %s1768_s20 = scalar_lea.vmem [#allocation15], %s930_s25  ;;  %p1918_p11 = scmp.ne.s32.totalorder %s1535_s19, 0 }
  0xc4   : > { %v444_v0 = vld [vmem:[#allocation7] sm:$0xff] (!%p1918_p11)  ;;  %vm445_vm0 = vcmask (!%p1918_p11), 261120   ;;  %v447_v1 = vld [vmem:[#allocation9] sm:$0xff] (!%p1918_p11) }
  0xc5   : > { %443 = sbr.rel (%p1918_p11) target bundleno = 204 (0xcc), region = 80  ;;  %446 = vst.msk [vmem:[#allocation2] sm:$0xff] (!%p1918_p11), %vm445_vm0, %v444_v0  ;;  %448 = vst.msk [vmem:[#allocation3] sm:$0xff] (!%p1918_p11), %vm445_vm0, %v447_v1 }
  0xcc PF: > { %v454_v2 = vld [vmem:[#allocation12] sm:$0xff]  ;;  %v455_v3 = vld [vmem:[#allocation12 + $0x8] sm:$0xff]  ;;  %v452_v4 = vld [vmem:[#allocation10] sm:$0xff]  ;;  %v1450_v5 = vmov 0.0|0.0   ;;  %vm1451_vm1 = vmmov 0   ;;  %v1452_v11 = vmov 0.0  }
  0xcd   : > { %994 = vmatprep.subr.bf16.mxu0 %v1450_v5  ;;  %v995_v6 = vpack.c.bf16 %v455_v3, %v454_v2  ;;  %1000 = vmatprep.subr.bf16.mxu1 %v1450_v5  ;;  %v453_v7 = vld [vmem:[#allocation10 + $0x8] sm:$0xff]  ;;  %v456_v8 = vld [vmem:[#allocation12 + $0x10] sm:$0xff]  ;;  %vm532_vm2 = vcmask 130048   ;;  %v449_v14 = vld [vmem:[#allocation2] sm:$0xff]  ;;  %vm458_vm3 = vcmask 261120   ;;  %s1453_s30 = smov 64  }
  0xce   : > { %v457_v9 = vld [vmem:[#allocation12 + $0x18] sm:$0xff]  ;;  %v1001_v10 = vpack.c.bf16 %v453_v7, %v452_v4  ;;  %980 = vmatprep.mubr.msk.f32.mxu1 %vm1451_vm1, %v1452_v11  ;;  %973 = vmatprep.mubr.msk.f32.mxu0 %vm1451_vm1, %v1452_v11  ;;  %v940_v18 = vld [vmem:[%s1883_s5] ss:$0 sm:$0xff]  ;;  %v450_v23 = vld [vmem:[#allocation3] sm:$0xff]  ;;  %s1454_s23 = smov 32   ;;  %s1455_s17 = smov 96  }
  0xcf   : > { %996 = vmatpush3.bf16.msra.mxu0 %v995_v6  ;;  %v998_v12 = vpack.c.bf16 %v457_v9, %v456_v8  ;;  %v451_v13 = vld [vmem:[%s1750_s24] sm:$0xff]  ;;  %v640_v34 = vld [vmem:[#allocation13] sm:$0xff]  ;;  %v641_v35 = vld [vmem:[#allocation13 + $0x8] sm:$0xff]  ;;  %p943_p13 = scmp.ne.s32.totalorder %s1535_s19, 7 }
  0xd0   : > { %997 = vmatprep.subr.bf16.mxu0 %v1450_v5  ;;  %1002 = vmatpush3.bf16.msra.mxu1 %v1001_v10  ;;  %v642_v36 = vld [vmem:[#allocation13 + $0x10] sm:$0xff]  ;;  %v1004_v37 = vpack.c.bf16 %v641_v35, %v640_v34  ;;  %v643_v38 = vld [vmem:[#allocation13 + $0x18] sm:$0xff]  ;;  %v941_v45 = vld [vmem:[%s1885_s7] ss:$0 sm:$0xff] }
  0xd1   : > { %1003 = vmatprep.subr.bf16.mxu1 %v1450_v5  ;;  %v1007_v39 = vpack.c.bf16 %v643_v38, %v642_v36 }
  0xd3   : > { %999 = vmatpush3.bf16.msra.mxu0 %v998_v12  ;;  %981 = vmatmul.mubr.msk.f32.vlgmr.msra.gmra.mrb[0].mxu1 %vm532_vm2, %v451_v13 }
  0xd4   : > { %991 = vmatprep.mubr.msk.f32.mxu1 %vm1451_vm1, %v1452_v11  ;;  %1005 = vmatpush3.bf16.msra.mxu1 %v1004_v37 }
  0xd5   : > { %1006 = vmatprep.subr.bf16.mxu1 %v1450_v5 }
  0xd6   : > { %974 = vmatmul.mubr.msk.f32.vlgmr.msra.gmra.mrb[0].mxu0 %vm458_vm3, %v449_v14 }
  0xd8   : > { %1008 = vmatpush3.bf16.msra.mxu1 %v1007_v39 }
 0x1a6   : > { %v602_v15 = vpop.f32.mrb[0].mxu1 }
 0x1a7   : > { %v982_v16 = vpop.f32.mrb[1].mxu1 }
 0x1a9   : > { %v528_v17 = vpop.f32.mrb[0].mxu0 }
 0x1aa   : > { %v603_v19 = vadd.f32 %v602_v15, %v528_v17  ;;  %v975_v20 = vpop.f32.mrb[1].mxu0 }
 0x1ac   : > { %v613_v21 = vadd.f32 %v940_v18, %v603_v19 }
 0x1ae   : > { %1128 = vtanh.f32 %v613_v21  ;;  %v614_v24 = vmul.f32 0.5, %v613_v21 }
 0x1b0   : > { %1130 = vtanh.f32 %v614_v24 }
 0x1b8   : > { %v1129_v22 = vpop.eup %1128 }
 0x1b9   : > { %625 = vrot.lane.b32.xlu0 %v1129_v22, %s1453_s30 }
 0x1ba   : > { %v1131_v25 = vpop.eup %1130 }
 0x1bb   : > { %v616_v26 = vadd.f32 1.0, %v1131_v25 }
 0x1bd   : > { %620 = vrot.lane.b32.xlu0 %v450_v23, %s1454_s23  ;;  %v617_v27 = vmul.f32 0.5, %v616_v26 }
 0x22b   : > { %v626_v28 = vpop.permute.xlu0 %625 }
 0x22c   : > { %v628_v29 = vmul.f32 %v626_v28, %v617_v27 }
 0x22e   : > { %630 = vrot.lane.b32.xlu1 %v628_v29, %s1454_s23 }
 0x22f   : > { %v621_v30 = vpop.permute.xlu0 %620 }
 0x230   : > { %v623_v31 = vmul.f32 %v621_v30, %v617_v27 }
 0x2a0   : > { %v631_v32 = vpop.permute.xlu1 %630 }
 0x2a1   : > { %v633_v33 = vadd.f32 %v631_v32, %v623_v31 }
 0x2a3   : > { %1132 = vtanh.f32 %v633_v33 }
 0x2ad   : > { %v1133_v40 = vpop.eup %1132 }
 0x2ae   : > { %636 = vrot.lane.b32.xlu1 %v1133_v40, %s1453_s30 }
 0x2b2   : > { %734 = vrot.lane.b32.xlu1 %v633_v33, %s1455_s17 }
 0x320   : > { %v637_v41 = vpop.permute.xlu1 %636 }
 0x321   : > { %v639_v42 = vmul.f32 %v637_v41, %v617_v27 }
 0x323   : > { %652 = vrot.lane.b32.xlu0 %v639_v42, %s1454_s23 }
 0x324   : > { %v735_v43 = vpop.permute.xlu1 %734 }
 0x325   : > { %737 = vst.msk [vmem:[#allocation3] sm:$0xff] %vm458_vm3, %v735_v43  ;;  %743 = vst.msk [vmem:[#allocation18] sm:$0xff] (!%p943_p13), %vm458_vm3, %v735_v43 }
 0x395   : > { %v653_v44 = vpop.permute.xlu0 %652 }
 0x396   : > { %732 = vst.msk [vmem:[#allocation2] sm:$0xff] %vm458_vm3, %v653_v44  ;;  %992 = vmatmul.mubr.msk.f32.vlgmr.msra.gmra.mrb[2].mxu1 %vm458_vm3, %v653_v44  ;;  %742 = vst.msk [vmem:[#allocation16] sm:$0xff] (!%p943_p13), %vm458_vm3, %v653_v44 }
 0x469   : > { %v722_v46 = vpop.f32.mrb[2].mxu1 }
 0x46a   : > { %v723_v47 = vadd.f32 %v941_v45, %v722_v46  ;;  %v993_v48 = vpop.f32.mrb[3].mxu1 }
 0x46c   : > { %v726_v49 = vmul.f32 0.5, %v723_v47 }
 0x46e   : > { %1134 = vtanh.f32 %v726_v49 }
 0x477   : > { %741 = sbr.rel (%p943_p13) target bundleno = 1150 (0x47e), region = 84 }
 0x478   : > { %v1135_v50 = vpop.eup %1134 }
 0x479   : > { %v728_v51 = vadd.f32 1.0, %v1135_v50 }
 0x47b   : > { %v729_v52 = vmul.f32 0.5, %v728_v51 }
 0x47d   : > { %730 = vst [vmem:[%s1768_s20] sm:$0xff] %v729_v52 }
 0x47e PF: > { %s1456_s26 = smov [#allocation16]   ;;  %s945_s28 = sshll.u32 %s1535_s19, 7 }
 0x47f   : > { %s769_s25 = sshll.u32 %s1456_s26, 4  ;;  %s1791_s29 = scalar_lea.hbm %s1886_s8, %s945_s28  ;;  %s770_s25 = int_to_ptr.vmem [resolvable:$true] %s769_s25 }
 0x480   : > { %s1306_s30 = scalar_lea.vmem %s770_s25, 128  ;;  %p1919_p7 = scmp.eq.s32.totalorder %s1535_s19, 7 }
 0x481   : > { %p1307_p5 = scmp.ne.s32.totalorder %s770_s25, %s1306_s30  ;;  %p1313_p10 = scmp.lt.s32.totalorder %s770_s25, %s770_s25 }
 0x482   : > { %p1314_p1 = scmp.lt.s32.totalorder %s1306_s30, %s1306_s30 }
 0x483   : > { %p1308_p3 = pnand %p1307_p5, %p1919_p7 }
 0x484   : > { %p1315_p6 = por %p1314_p1, %p1313_p10 }
 0x485   : > { %p1309_p4 = pneg %p1308_p3 }
 0x487   : > { %p1316_p0 = pnand %p1315_p6, %p1309_p4 }
 0x489   : > { %1319 = shalt.err (!%p1316_p0)
}
 0x48a   : > { %s1320_s1 = scalar_lea.hbm %s1887_s9, 128  ;;  %p1920_p8 = pmov %p1919_p7 }
 0x48b   : > { %p1321_p2 = scmp.ne.s32.totalorder %s1887_s9, %s1320_s1  ;;  %p1326_p11 = scmp.lt.u32.totalorder %s1320_s1, %s1887_s9 }
 0x48d   : > { %p1322_p9 = pnand %p1321_p2, %p1920_p8 }
 0x48f   : > { %p1323_p12 = pneg %p1322_p9 }
 0x491   : > { %p1328_p13 = pnand %p1326_p11, %p1323_p12 }
 0x493   : > { %1331 = shalt.err (!%p1328_p13)
}
 0x494   : > { %p1921_p5 = pmov %p1919_p7  ;;  %s758_s23 = sshll.u32 %s1768_s20, 4  ;;  %s1812_s23 = int_to_ptr.vmem [resolvable:$true] %s758_s23 }
 0x495   : > { %s1457_s17 = smov [#allocation18]   ;;  %s745_s1 = scalar_lea.sflag [#allocation6], %s1746_s2 }
 0x496   : > { %1033 = dma.vmem_to_hbm [thread:$0]  (%p1921_p5), %s770_s25, 128, %s1887_s9, [#allocation17]  }
 0x497   : > { %s1814_s22 = sshll.u32 %s1457_s17, 4  ;;  %s1332_s26 = scalar_lea.vmem %s1812_s23, 128  ;;  %s781_s22 = int_to_ptr.vmem [resolvable:$true] %s1814_s22 }
 0x498   : > { %p1333_p7 = scmp.ne.s32.totalorder %s1812_s23, %s1332_s26  ;;  %p1922_p3 = scmp.ne.s32.totalorder %s1908_s12, 0 }
 0x499   : > { %s1458_s28 = smov [#allocation15]  }
 0x49a   : > { %p1334_p4 = pnand %p1333_p7, %p1922_p3  ;;  %s1336_s24 = sshll.u32 %s1458_s28, 4  ;;  %s1337_s24 = int_to_ptr.vmem [resolvable:$false] %s1336_s24 }
 0x49b   : > { %s1338_s18 = scalar_lea.vmem %s1337_s24, 256  ;;  %p1339_p1 = scmp.lt.s32.totalorder %s1812_s23, %s1337_s24 }
 0x49c   : > { %p1335_p10 = pneg %p1334_p4  ;;  %p1340_p6 = scmp.lt.s32.totalorder %s1338_s18, %s1332_s26 }
 0x49e   : > { %p1341_p0 = por %p1340_p6, %p1339_p1 }
 0x4a0   : > { %p1342_p2 = pnand %p1341_p0, %p1335_p10 }
 0x4a2   : > { %1345 = shalt.err (!%p1342_p2)
}
 0x4a3   : > { %s1346_s2 = scalar_lea.hbm %s1791_s29, 128  ;;  %s1350_s30 = scalar_lea.hbm %s1886_s8, 1024 }
 0x4a4   : > { %p1347_p8 = scmp.ne.s32.totalorder %s1791_s29, %s1346_s2  ;;  %p1351_p11 = scmp.lt.u32.totalorder %s1791_s29, %s1886_s8 }
 0x4a5   : > { %p1352_p13 = scmp.lt.u32.totalorder %s1350_s30, %s1346_s2  ;;  %p1354_p7 = scmp.lt.u32.totalorder %s1346_s2, %s1791_s29 }
 0x4a6   : > { %p1348_p9 = pnand %p1347_p8, %p1922_p3 }
 0x4a7   : > { %p1353_p5 = por %p1352_p13, %p1351_p11 }
 0x4a8   : > { %p1349_p12 = pneg %p1348_p9 }
 0x4a9   : > { %p1355_p4 = por %p1354_p7, %p1353_p5 }
 0x4ab   : > { %p1356_p10 = pnand %p1355_p4, %p1349_p12 }
 0x4ad   : > { %1359 = shalt.err (!%p1356_p10)
}
 0x4ae   : > { %1031 = dma.vmem_to_hbm [thread:$0]  (%p1922_p3), %s1812_s23, 128, %s1791_s29, %s745_s1  }
 0x4af   : > { %s1360_s26 = scalar_lea.vmem %s781_s22, 128  ;;  %p1923_p6 = scmp.eq.s32.totalorder %s1535_s19, 7 }
 0x4b0   : > { %p1361_p1 = scmp.ne.s32.totalorder %s781_s22, %s1360_s26  ;;  %p1367_p8 = scmp.lt.s32.totalorder %s781_s22, %s781_s22 }
 0x4b1   : > { %p1368_p9 = scmp.lt.s32.totalorder %s1360_s26, %s1360_s26 }
 0x4b2   : > { %p1362_p0 = pnand %p1361_p1, %p1923_p6 }
 0x4b3   : > { %p1369_p11 = por %p1368_p9, %p1367_p8 }
 0x4b4   : > { %p1363_p2 = pneg %p1362_p0 }
 0x4b6   : > { %p1370_p13 = pnand %p1369_p11, %p1363_p2 }
 0x4b8   : > { %1373 = shalt.err (!%p1370_p13)
}
 0x4b9   : > { %s1374_s12 = scalar_lea.hbm %s1888_s10, 128  ;;  %p1924_p12 = pmov %p1923_p6 }
 0x4ba   : > { %p1375_p3 = scmp.ne.s32.totalorder %s1888_s10, %s1374_s12  ;;  %p1380_p4 = scmp.lt.u32.totalorder %s1374_s12, %s1888_s10 }
 0x4bc   : > { %p1376_p5 = pnand %p1375_p3, %p1924_p12 }
 0x4be   : > { %p1377_p7 = pneg %p1376_p5 }
 0x4c0   : > { %p1382_p10 = pnand %p1380_p4, %p1377_p7 }
 0x4c2   : > { %1385 = shalt.err (!%p1382_p10)
}
 0x4c3   : > { %p1925_p1 = pmov %p1923_p6 }
 0x4c5   : > { %1035 = dma.vmem_to_hbm [thread:$0]  (%p1925_p1), %s781_s22, 128, %s1888_s10, [#allocation17]  }
 0x4c6   : > { %p1926_p6 = pmov %p1925_p1 }
 0x4c7   : > { %p1927_p0 = pmov %p1925_p1 }
 0x4c8   : > { %1419 = dma.done.wait (%p1926_p6), [#allocation17], 256  }
 0x4c9   : > { %1421 = vsyncadd (%p1927_p0), [#allocation17], 4294967040 }
 0x4ca PF: > { %p1080_p2 = scmp.ge.s32.totalorder %s1440_s16, 2  ;;  %s800_s30 = sand.u32 1, %s1428_s13  }
 0x4cb   : > { %p1928_p8 = scmp.ne.s32.totalorder %s1909_s27, 0  ;;  %s801_s17 = scalar_lea.sflag [#allocation6], %s800_s30 }
 0x4cd   : > { %p1062_p9 = pnand %p1080_p2, %p1928_p8 }
 0x4cf   : > { %1423 = dma.done.wait (!%p1062_p9), %s801_s17, 128  }
 0x4d0   : > { %1425 = vsyncadd (!%p1062_p9), %s801_s17, 4294967168  ;;  %p28_p11 = scmp.ge.s32.totalorder %s1674_s11, 10   ;;  %s1929_s13 = smov %s1432_s14 }
 0x4d1   : > { %s1930_s14 = smov %s1436_s15  ;;  %s1931_s15 = smov %s1686_s21 }
 0x4d2   : > { %s1932_s16 = smov %s1674_s11  ;;  %30 = sbr.rel (!%p28_p11) target bundleno = 12 (0xc), region = 141 }
 0x4d9   :  { %806 = vsyncpa [#allocation5], 1 }
 0x4da   :  { %808 = vsyncpa [#allocation5 + $0x1], 1 }
 0x4db   :  { %809 = vsyncpa [#allocation8], 1 }
 0x4dc   :  { %810 = vsyncpa [#allocation11], 1 }
 0x4dd   :  { %811 = vsyncpa [#allocation14], 1 }
 0x4de   :  { %812 = vsyncpa [#allocation6], 1 }
 0x4df   :  { %814 = vsyncpa [#allocation6 + $0x1], 1 }
 0x4e0   :  { %815 = vsyncpa [#allocation17], 1 }

</bundles_post_ra>
